<compile_context>
chip_gen: v6e
topology: v6e:2x2x1
jax: 0.10.0
libtpu: 0.0.40
codegen_flags: <defaults>
</compile_context>

<pallas_src>
import functools

import jax
import jax.numpy as jnp
from jax import lax
from jax.experimental import pallas as pl
from jax.experimental.pallas import tpu as pltpu


def _weighted_l1_kernel(n_rows, tm, w_ref, yp_ref, yt_ref, out_ref):
    """One grid step: weighted |diff| partial sum for a (tm, C) row tile.

    Writes a (1, 1, C) lane-dense partial so each grid step owns a distinct
    output block (grid axis can be 'parallel').
    """
    i = pl.program_id(0)

    # Cast to f32 in-kernel; inputs stay in native dtype in HBM.
    yp = yp_ref[...].astype(jnp.float32)
    yt = yt_ref[...].astype(jnp.float32)
    diff = jnp.abs(yp - yt)  # (tm, C) f32

    # Mask rows of the (possibly partial) tail tile.
    row = i * tm + lax.broadcasted_iota(jnp.int32, diff.shape, 0)
    diff = jnp.where(row < n_rows, diff, jnp.float32(0.0))

    # Reduce over rows first (sublane reduce), then ONE (1, C) weight multiply.
    row_sum = jnp.sum(diff, axis=0, keepdims=True)              # (1, C)
    out_ref[...] = (w_ref[...].astype(jnp.float32) * row_sum)[None]  # (1, 1, C)


def _choose_tm(n, c, itemsize, vmem_budget_bytes=8 << 20):
    """Largest sublane-aligned row tile keeping 2 inputs x 2 pipeline buffers in budget."""
    per_row_bytes = 2 * 2 * c * itemsize  # 2 inputs, double-buffered
    tm = vmem_budget_bytes // max(per_row_bytes, 1)
    tm = min(tm, 2048, n)
    tm = max(8, (tm // 8) * 8)
    if tm >= n:
        return n  # single block covering the full batch (full-dim block is always legal)
    return tm


def weighted_l1_loss(y_pred, y_true, weights, *, tm=None):
    """Pallas implementation of WeightedL1Loss.forward for 2-D (N, C) inputs."""
    N, C = y_pred.shape
    assert y_true.shape == (N, C)
    assert weights.shape == (C,)
    # TODO(synk): >2-D inputs (mean over dim=1 only) not implemented; the module
    # is used with 2-D (batch, channel) predictions here.

    if tm is None:
        tm = _choose_tm(N, C, jnp.dtype(y_pred.dtype).itemsize)
    num_tiles = pl.cdiv(N, tm)

    w2d = weights.reshape(1, C)  # keep native dtype; cast in kernel

    partials = pl.pallas_call(
        functools.partial(_weighted_l1_kernel, N, tm),
        out_shape=jax.ShapeDtypeStruct((num_tiles, 1, C), jnp.float32),
        grid_spec=pltpu.PrefetchScalarGridSpec(
            num_scalar_prefetch=0,
            grid=(num_tiles,),
            in_specs=[
                pl.BlockSpec((1, C), lambda i: (0, 0)),    # weights (resident)
                pl.BlockSpec((tm, C), lambda i: (i, 0)),   # y_pred row tile
                pl.BlockSpec((tm, C), lambda i: (i, 0)),   # y_true row tile
            ],
            out_specs=pl.BlockSpec((1, 1, C), lambda i: (i, 0, 0)),  # per-tile partial
        ),
        compiler_params=pltpu.CompilerParams(
            dimension_semantics=("parallel",),  # independent tiles -> megacore-shardable
        ),
    )(w2d, y_pred, y_true)

    # mean over dim=1 then mean over dim=0 == total_sum / (N * C) for dense rows.
    return jnp.sum(partials) / jnp.float32(N * C)


if __name__ == "__main__":
    key = jax.random.PRNGKey(0)
    k1, k2 = jax.random.split(key)

    # Case 1: f32, lane-aligned, single-block path.
    N, C = 32, 128
    y_pred = jax.random.normal(k1, (N, C), dtype=jnp.float32)
    y_true = jax.random.normal(k2, (N, C), dtype=jnp.float32)
    weights = (jnp.arange(C, dtype=jnp.float32) + 1.0) / jnp.float32(C)

    loss = jax.block_until_ready(weighted_l1_loss(y_pred, y_true, weights))
    ref = jnp.mean(jnp.mean(weights[None, :] * jnp.abs(y_pred - y_true), axis=1))
    assert jnp.allclose(loss, ref, rtol=1e-5, atol=1e-6), (loss, ref)

    # Case 2: bf16 inputs (no wrapper upcast) + batch not divisible by the tile
    # (exercises the in-kernel cast and the tail mask with multiple grid steps).
    N2, C2 = 45, 128
    yp2 = jax.random.normal(k1, (N2, C2), dtype=jnp.bfloat16)
    yt2 = jax.random.normal(k2, (N2, C2), dtype=jnp.bfloat16)
    w2 = (jnp.arange(C2, dtype=jnp.float32) + 1.0) / jnp.float32(C2)

    loss2 = jax.block_until_ready(weighted_l1_loss(yp2, yt2, w2, tm=16))
    ref2 = jnp.mean(
        jnp.mean(
            w2[None, :]
            * jnp.abs(yp2.astype(jnp.float32) - yt2.astype(jnp.float32)),
            axis=1,
        )
    )
    assert jnp.allclose(loss2, ref2, rtol=2e-2, atol=1e-3), (loss2, ref2)

    print("KERNEL_OK")
</pallas_src>

<mosaic_0001>
module attributes {stable_mosaic.version = 11 : i64} {
  func.func @_weighted_l1_kernel(%arg0: i32, %arg1: memref<1x128xf32, #tpu.memory_space<vmem>>, %arg2: memref<32x128xf32, #tpu.memory_space<vmem>>, %arg3: memref<32x128xf32, #tpu.memory_space<vmem>>, %arg4: memref<1x1x128xf32, #tpu.memory_space<vmem>>) attributes {dimension_semantics = [#tpu.dimension_semantics<parallel>], iteration_bounds = array<i64: 1>, scalar_prefetch = 0 : i64, scratch_operands = 0 : i64, tpu.core_type = #tpu.core_type<tc>, window_params = [{pipeline_mode = #tpu.pipeline_mode<synchronous>, transform_indices = @transform_0, window_bounds = array<i64: 1, 128>}, {transform_indices = @transform_1, window_bounds = array<i64: 32, 128>}, {transform_indices = @transform_2, window_bounds = array<i64: 32, 128>}, {transform_indices = @transform_3, window_bounds = array<i64: 1, 1, 128>}]} {
    %c0 = arith.constant 0 : index
    %c0_0 = arith.constant 0 : index
    %0 = vector.load %arg2[%c0, %c0_0] : memref<32x128xf32, #tpu.memory_space<vmem>>, vector<32x128xf32>
    %c0_1 = arith.constant 0 : index
    %c0_2 = arith.constant 0 : index
    %1 = vector.load %arg3[%c0_1, %c0_2] : memref<32x128xf32, #tpu.memory_space<vmem>>, vector<32x128xf32>
    %2 = arith.subf %0, %1 : vector<32x128xf32>
    %3 = math.absf %2 : vector<32x128xf32>
    %c32_i32 = arith.constant 32 : i32
    %4 = arith.muli %arg0, %c32_i32 : i32
    %5 = tpu.iota {dimensions = array<i32: 0>} : vector<32x128xi32>
    %6 = vector.broadcast %4 : i32 to vector<32x128xi32>
    %7 = arith.addi %6, %5 : vector<32x128xi32>
    %c32_i32_3 = arith.constant 32 : i32
    %8 = vector.broadcast %c32_i32_3 : i32 to vector<32x128xi32>
    %9 = arith.cmpi slt, %7, %8 : vector<32x128xi32>
    %cst = arith.constant 0.000000e+00 : f32
    %10 = vector.broadcast %cst : f32 to vector<32x128xf32>
    %11 = arith.select %9, %3, %10 : vector<32x128xi1>, vector<32x128xf32>
    %cst_4 = arith.constant dense<0.000000e+00> : vector<128xf32>
    %12 = vector.multi_reduction <add>, %11, %cst_4 [0] : vector<32x128xf32> to vector<128xf32>
    %13 = vector.shape_cast %12 : vector<128xf32> to vector<1x128xf32>
    %c0_5 = arith.constant 0 : index
    %c0_6 = arith.constant 0 : index
    %14 = vector.load %arg1[%c0_5, %c0_6] : memref<1x128xf32, #tpu.memory_space<vmem>>, vector<1x128xf32>
    %15 = arith.mulf %14, %13 : vector<1x128xf32>
    %16 = vector.shape_cast %15 : vector<1x128xf32> to vector<1x1x128xf32>
    %c0_7 = arith.constant 0 : index
    %c0_8 = arith.constant 0 : index
    %c0_9 = arith.constant 0 : index
    %17 = vector.load %arg4[%c0_7, %c0_8, %c0_9] : memref<1x1x128xf32, #tpu.memory_space<vmem>>, vector<1x1x128xf32>
    tpu.vector_store %arg4[%c0_7, %c0_8, %c0_9], %16 {strides = array<i32>} : memref<1x1x128xf32, #tpu.memory_space<vmem>>, vector<1x1x128xf32>,
    return
  }
  func.func @transform_0(%arg0: i32) -> (i32, i32) {
    %c0_i32 = arith.constant 0 : i32
    %c0_i32_0 = arith.constant 0 : i32
    %c0_i32_1 = arith.constant 0 : i32
    return %c0_i32, %c0_i32_0 : i32, i32
  }
  func.func @transform_1(%arg0: i32) -> (i32, i32) {
    %c0_i32 = arith.constant 0 : i32
    %c0_i32_0 = arith.constant 0 : i32
    return %arg0, %c0_i32 : i32, i32
  }
  func.func @transform_2(%arg0: i32) -> (i32, i32) {
    %c0_i32 = arith.constant 0 : i32
    %c0_i32_0 = arith.constant 0 : i32
    return %arg0, %c0_i32 : i32, i32
  }
  func.func @transform_3(%arg0: i32) -> (i32, i32, i32) {
    %c0_i32 = arith.constant 0 : i32
    %c0_i32_0 = arith.constant 0 : i32
    %c0_i32_1 = arith.constant 0 : i32
    return %arg0, %c0_i32, %c0_i32_0 : i32, i32, i32
  }
}

</mosaic_0001>

<bundles_post_ra>
// kernel: tpu_custom_call.1
= control target key start
LH: loop header
LB: loop body
LE: loop exit
PB: predicated region body
PF: predicated region fallthrough
CT: control target
= control target key end

     0   :  { %8 = vsyncpa [#allocation3], 0  ;;  %s247_s0 = inlined_call_operand.hbm [shape: f32[1,128], index: 0, kind: input, shape index: {}]   ;;  %s248_s1 = inlined_call_operand.hbm [shape: f32[32,128], index: 1, kind: input, shape index: {}]   ;;  %s249_s2 = inlined_call_operand.hbm [shape: f32[32,128], index: 2, kind: input, shape index: {}]   ;;  %s250_s3 = inlined_call_operand.hbm [shape: f32[1,1,128], index: 3, kind: output, shape index: {}]  }
   0x1   :  { %9 = vsyncpa [#allocation6], 0 }
   0x2   :  { %10 = vsyncpa [#allocation4], 0  ;;  %s209_s12 = smov [#allocation5]  }
   0x3   :  { %s26_s13 = sshll.u32 %s209_s12, 4  ;;  %s27_s13 = int_to_ptr.vmem [resolvable:$true] %s26_s13 }
   0x4   :  { %s131_s14 = scalar_lea.vmem %s27_s13, 512  ;;  %p136_p1 = scmp.lt.s32.totalorder %s27_s13, %s27_s13 }
   0x5   :  { %p132_p0 = scmp.ne.s32.totalorder %s27_s13, %s131_s14  ;;  %p137_p2 = scmp.lt.s32.totalorder %s131_s14, %s131_s14 }
   0x7   :  { %p138_p3 = por %p137_p2, %p136_p1 }
   0x9   :  { %p139_p4 = pnand %p138_p3, %p132_p0 }
   0xb   :  { %142 = shalt.err (!%p139_p4)
}
   0xc   :  { %s210_s15 = smov 128   ;;  %s211_s16 = smov 8  }
   0xd   :  { %32 = dma.hbm_to_vmem [thread:$0]  %s248_s1, 512, %s27_s13, [#allocation6], %s210_s15, %s210_s15, %s211_s16  }
   0xe   :  { %s212_s19 = smov [#allocation2]   ;;  %s213_s21 = smov [#allocation7]  }
   0xf   :  { %s17_s20 = sshll.u32 %s212_s19, 4  ;;  %s38_s22 = sshll.u32 %s213_s21, 4  ;;  %s18_s20 = int_to_ptr.vmem [resolvable:$true] %s17_s20  ;;  %s39_s22 = int_to_ptr.vmem [resolvable:$true] %s38_s22 }
  0x10   :  { %s151_s23 = scalar_lea.vmem %s18_s20, 16  ;;  %s155_s24 = scalar_lea.vmem %s18_s20, 32 }
  0x11   :  { %p152_p5 = scmp.ne.s32.totalorder %s18_s20, %s151_s23  ;;  %p156_p6 = scmp.lt.s32.totalorder %s18_s20, %s18_s20 }
  0x12   :  { %p157_p7 = scmp.lt.s32.totalorder %s155_s24, %s151_s23 }
  0x14   :  { %p158_p8 = por %p157_p7, %p156_p6 }
  0x16   :  { %p159_p9 = pnand %p158_p8, %p152_p5 }
  0x18   :  { %162 = shalt.err (!%p159_p9)
}
  0x19   :  { %20 = dma.hbm_to_vmem [thread:$0]  %s247_s0, 16, %s18_s20, [#allocation3]  }
  0x1a   :  { %s171_s27 = scalar_lea.vmem %s39_s22, 512  ;;  %p176_p11 = scmp.lt.s32.totalorder %s39_s22, %s39_s22 }
  0x1b   :  { %p172_p10 = scmp.ne.s32.totalorder %s39_s22, %s171_s27  ;;  %p177_p12 = scmp.lt.s32.totalorder %s171_s27, %s171_s27 }
  0x1d   :  { %p178_p13 = por %p177_p12, %p176_p11 }
  0x1f   :  { %p179_p0 = pnand %p178_p13, %p172_p10 }
  0x21   :  { %182 = shalt.err (!%p179_p0)
}
  0x22   :  { %44 = dma.hbm_to_vmem [thread:$0]  %s249_s2, 512, %s39_s22, [#allocation6], %s210_s15, %s210_s15, %s211_s16  }
  0x23   :  { %203 = dma.done.wait [#allocation3], 16  }
  0x24   :  { %204 = vsyncadd [#allocation3], 4294967280 }
  0x25   :  { %205 = dma.done.wait [#allocation6], 1024  }
  0x26   :  { %206 = vsyncadd [#allocation6], 4294966272  ;;  %v54_v0 = vld [vmem:[#allocation5] sm:$0xff]  ;;  %v55_v1 = vld [vmem:[#allocation5 + $0x8] sm:$0xff]  ;;  %s214_s0 = smov [#allocation8]  }
  0x27   :  { %v56_v2 = vld [vmem:[#allocation5 + $0x10] sm:$0xff]  ;;  %v57_v3 = vld [vmem:[#allocation5 + $0x18] sm:$0xff]  ;;  %v58_v4 = vld [vmem:[#allocation7] sm:$0xff]  ;;  %s107_s2 = sshll.u32 %s214_s0, 4  ;;  %s108_s2 = int_to_ptr.vmem [resolvable:$true] %s107_s2 }
  0x28   :  { %v59_v5 = vld [vmem:[#allocation7 + $0x8] sm:$0xff]  ;;  %v60_v6 = vld [vmem:[#allocation7 + $0x10] sm:$0xff]  ;;  %v61_v7 = vld [vmem:[#allocation7 + $0x18] sm:$0xff]  ;;  %v62_v8 = vsub.f32 %v54_v0, %v58_v4  ;;  %s183_s29 = scalar_lea.vmem %s108_s2, 16  ;;  %s187_s30 = scalar_lea.vmem %s108_s2, 32 }
  0x29   :  { %v63_v9 = vsub.f32 %v55_v1, %v59_v5  ;;  %v64_v10 = vsub.f32 %v56_v2, %v60_v6  ;;  %v65_v11 = vsub.f32 %v57_v3, %v61_v7  ;;  %v98_v24 = vld [vmem:[#allocation2] sm:$0x1]  ;;  %p184_p1 = scmp.ne.s32.totalorder %s108_s2, %s183_s29  ;;  %p188_p2 = scmp.lt.s32.totalorder %s108_s2, %s108_s2 }
  0x2a   :  { %v66_v12 = vand.u32 2147483647, %v62_v8  ;;  %p189_p3 = scmp.lt.s32.totalorder %s187_s30, %s183_s29 }
  0x2b   :  { %v67_v13 = vand.u32 2147483647, %v63_v9  ;;  %v68_v14 = vand.u32 2147483647, %v64_v10  ;;  %v69_v15 = vand.u32 2147483647, %v65_v11 }
  0x2c   :  { %p190_p4 = por %p189_p3, %p188_p2 }
  0x2d   :  { %v89_v16 = vadd.f32 %v67_v13, %v66_v12 }
  0x2e   :  { %p191_p5 = pnand %p190_p4, %p184_p1 }
  0x2f   :  { %v90_v17 = vadd.f32 %v89_v16, %v68_v14 }
  0x31   :  { %v91_v18 = vadd.f32 %v90_v17, %v69_v15 }
  0x33   :  { %v92_v19 = vrot.slane %v91_v18, 4 }
  0x35   :  { %v93_v20 = vadd.f32 %v92_v19, %v91_v18 }
  0x37   :  { %v94_v21 = vrot.slane %v93_v20, 2 }
  0x39   :  { %v95_v22 = vadd.f32 %v94_v21, %v93_v20 }
  0x3b   :  { %v96_v23 = vrot.slane %v95_v22, 1 }
  0x3d   :  { %v97_v25 = vadd.f32 %v96_v23, %v95_v22 }
  0x3f   :  { %v99_v26 = vmul.f32 %v98_v24, %v97_v25 }
  0x41   :  { %100 = vst [vmem:[#allocation8] sm:$0x1] %v99_v26 }
  0x42   :  { %194 = shalt.err (!%p191_p5)
}
  0x43   :  { %110 = dma.vmem_to_hbm [thread:$0]  %s108_s2, 16, %s250_s3, [#allocation4]  }
  0x44   :  { %207 = dma.done.wait [#allocation4], 16  }
  0x45   :  { %208 = vsyncadd [#allocation4], 4294967280 }
  0x46   :  { %114 = vsyncpa [#allocation3], 1 }
  0x47   :  { %115 = vsyncpa [#allocation6], 1 }
  0x48   :  { %116 = vsyncpa [#allocation4], 1 }

</bundles_post_ra>
